<compile_context>
chip_gen: v5e
topology: v5e:2x2
jax: 0.10.0
libtpu: 0.0.40
codegen_flags: <defaults>
</compile_context>

<pallas_src>
import functools
import math

import jax
import jax.numpy as jnp
from jax.experimental import pallas as pl
from jax.experimental.pallas import tpu as pltpu


# ----------------------------- Pallas kernel --------------------------------
def bert_layers_kernel(bias_ref,                       # (1, S)  additive mask
                       x_ref,                          # (S, H)  embeddings
                       wq_ref, wk_ref, wv_ref, wo_ref, # bf16 weight slabs
                       w1_ref, w2_ref,
                       vec_ref,                        # (10, Wmax) packed f32
                       out_ref,                        # (S, H)  residual stream
                       *, num_heads, head_dim):
    layer = pl.program_id(1)

    # Seed the VMEM-resident residual with the embeddings at layer 0.
    # (Output blocks are never preloaded from HBM, so even with the HBM-level
    #  input/output alias this one VMEM copy is required.)
    @pl.when(layer == 0)
    def _():
        out_ref[...] = x_ref[...]

    S, H = out_ref.shape
    nh, dh = num_heads, head_dim
    qdim = nh * dh
    ffn = w1_ref.shape[-1]
    f32, bf16 = jnp.float32, jnp.bfloat16

    x = out_ref[...]                                   # (S, H) f32 residual
    x_bf = x.astype(bf16)

    # Packed per-layer vectors (f32). Row layout:
    # 0:bq 1:bk 2:bv 3:bo 4:gamma1 5:beta1 6:b1 7:b2 8:gamma2 9:beta2
    bq  = vec_ref[0:1, :qdim]
    bk  = vec_ref[1:2, :qdim]
    bv  = vec_ref[2:3, :qdim]
    bo  = vec_ref[3:4, :H]
    g1  = vec_ref[4:5, :H]
    be1 = vec_ref[5:6, :H]
    b1  = vec_ref[6:7, :ffn]
    b2  = vec_ref[7:8, :H]
    g2  = vec_ref[8:9, :H]
    be2 = vec_ref[9:10, :H]

    def matmul(a_bf, w_ref):                           # bf16 x bf16 -> f32 acc
        return jnp.dot(a_bf, w_ref[...], preferred_element_type=f32)

    # ---- multi-head attention (1/sqrt(dh) folded into wq/bq in the wrapper)
    q2 = (matmul(x_bf, wq_ref) + bq).astype(bf16)      # (S, nh*dh)
    k2 = (matmul(x_bf, wk_ref) + bk).astype(bf16)
    v2 = (matmul(x_bf, wv_ref) + bv).astype(bf16)

    def split_heads(t2):                               # -> heads-leading (nh,S,dh)
        return jnp.stack([t2[:, h * dh:(h + 1) * dh] for h in range(nh)],
                         axis=0)
    qh, kh, vh = split_heads(q2), split_heads(k2), split_heads(v2)

    s = jnp.einsum('hqd,hkd->hqk', qh, kh,
                   preferred_element_type=f32)         # (nh, S, S) f32
    s = s + bias_ref[...]                              # (1, S) additive mask
    s = s - jnp.max(s, axis=-1, keepdims=True)
    p = jnp.exp(s)
    p = p * pl.reciprocal(jnp.sum(p, axis=-1, keepdims=True), approx=False)

    ctx = jnp.einsum('hqk,hkd->hqd', p.astype(bf16), vh,
                     preferred_element_type=f32)       # (nh, S, dh)
    # Merge heads on the lane dim -> single wide-K output projection.
    ctx2 = jnp.concatenate([ctx[h] for h in range(nh)], axis=-1)   # (S, nh*dh)
    attn = matmul(ctx2.astype(bf16), wo_ref) + bo                  # (S, H) f32

    def layer_norm(z, g, b):                           # f32 elementwise
        mu = jnp.mean(z, axis=-1, keepdims=True)
        zc = z - mu
        var = jnp.mean(zc * zc, axis=-1, keepdims=True)
        return zc * jax.lax.rsqrt(var + 1e-5) * g + b

    # AddNorm 1 (dropout p=0 -> identity)
    y1 = layer_norm(x + attn, g1, be1)

    # PositionWiseFFN
    h1 = jnp.maximum(matmul(y1.astype(bf16), w1_ref) + b1, 0.0)
    f2 = matmul(h1.astype(bf16), w2_ref) + b2

    # AddNorm 2 -> residual stream (HBM writeback once per batch block)
    out_ref[...] = layer_norm(y1 + f2, g2, be2)


# ----------------------------- wrapper ---------------------------------------
def bert_layers(x, valid_lens, layers, *, num_heads, head_dim):
    """x: (B, S, H) f32 embeddings; valid_lens: (B,) i32; layers: 16-param lists."""
    B, S, H = x.shape
    L = len(layers)
    nh, dh = num_heads, head_dim
    qdim = nh * dh
    scale = 1.0 / math.sqrt(dh)

    def stack(idx):
        return jnp.stack([layers[l][idx] for l in range(L)])

    # bf16 weight slabs (scale folded into W_q before the cast).
    wq_s = (stack(0) * scale).astype(jnp.bfloat16)      # (L, H, qdim)
    wk_s = stack(2).astype(jnp.bfloat16)                # (L, H, qdim)
    wv_s = stack(4).astype(jnp.bfloat16)                # (L, H, qdim)
    wo_s = stack(6).astype(jnp.bfloat16)                # (L, qdim, H)
    w1_s = stack(10).astype(jnp.bfloat16)               # (L, H, ffn)
    w2_s = stack(12).astype(jnp.bfloat16)               # (L, ffn, H)
    ffn = w1_s.shape[-1]
    assert wq_s.shape[-1] == qdim

    # Pack the 10 small per-layer vectors into one f32 slab: (L, 10, Wmax).
    Wmax = max(qdim, H, ffn)

    def pad_row(v):
        v = v.reshape(-1)
        return jnp.pad(v, (0, Wmax - v.shape[0]))

    vec_rows = []
    for l in range(L):
        (wq, bq, wk, bk, wv, bv, wo, bo, g1, be1,
         w1, b1, w2, b2, g2, be2) = layers[l]
        rows = [bq * scale, bk, bv, bo, g1, be1, b1, b2, g2, be2]
        vec_rows.append(jnp.stack([pad_row(r) for r in rows]))
    vecs = jnp.stack(vec_rows).astype(jnp.float32)      # (L, 10, Wmax)

    # Additive attention mask, computed once (constant across layers).
    key_pos = jnp.arange(S, dtype=jnp.int32)[None, None, :]          # (1,1,S)
    bias = jnp.where(key_pos < valid_lens.astype(jnp.int32)[:, None, None],
                     0.0, -1e9).astype(jnp.float32)                  # (B,1,S)

    kernel = functools.partial(bert_layers_kernel, num_heads=nh, head_dim=dh)

    grid_spec = pltpu.PrefetchScalarGridSpec(
        num_scalar_prefetch=0,
        grid=(B, L),                                    # (parallel, arbitrary)
        in_specs=[
            pl.BlockSpec((None, 1, S),     lambda b, l: (b, 0, 0)),  # mask bias
            pl.BlockSpec((None, S, H),     lambda b, l: (b, 0, 0)),  # embeddings
            pl.BlockSpec((None, H, qdim),  lambda b, l: (l, 0, 0)),  # W_q
            pl.BlockSpec((None, H, qdim),  lambda b, l: (l, 0, 0)),  # W_k
            pl.BlockSpec((None, H, qdim),  lambda b, l: (l, 0, 0)),  # W_v
            pl.BlockSpec((None, qdim, H),  lambda b, l: (l, 0, 0)),  # W_o
            pl.BlockSpec((None, H, ffn),   lambda b, l: (l, 0, 0)),  # W_1
            pl.BlockSpec((None, ffn, H),   lambda b, l: (l, 0, 0)),  # W_2
            pl.BlockSpec((None, 10, Wmax), lambda b, l: (l, 0, 0)),  # packed vecs
        ],
        # Constant index_map across the layer axis -> residual block stays
        # resident in VMEM for all layers of this batch element; one HBM
        # writeback per batch block.
        out_specs=pl.BlockSpec((None, S, H), lambda b, l: (b, 0, 0)),
    )

    flops = int(2 * B * L * (3 * S * H * qdim          # QKV projections
                             + 2 * S * S * qdim        # scores + context
                             + S * qdim * H            # W_o
                             + 2 * S * H * ffn))       # FFN
    transcendentals = int(B * L * (nh * S * S + 3 * S))
    bytes_accessed = int(x.nbytes * 2 + bias.nbytes
                         + B * (wq_s.nbytes + wk_s.nbytes + wv_s.nbytes
                                + wo_s.nbytes + w1_s.nbytes + w2_s.nbytes
                                + vecs.nbytes))

    return pl.pallas_call(
        kernel,
        out_shape=jax.ShapeDtypeStruct((B, S, H), jnp.float32),
        grid_spec=grid_spec,
        # Embeddings are only read at layer 0; reuse their HBM buffer for the
        # output (P8).  The VMEM-level seed copy in the kernel is still needed
        # because output blocks are not preloaded.
        input_output_aliases={1: 0},
        compiler_params=pltpu.CompilerParams(
            dimension_semantics=("parallel", "arbitrary")),
        cost_estimate=pl.CostEstimate(flops=flops,
                                      transcendentals=transcendentals,
                                      bytes_accessed=bytes_accessed),
    )(bias, x, wq_s, wk_s, wv_s, wo_s, w1_s, w2_s, vecs)


# ----------------------------- parameter setup ------------------------------
def init_linear(key, in_dim, out_dim, scale=0.05):
    kw, kb = jax.random.split(key)
    w = scale * jax.random.normal(kw, (in_dim, out_dim), jnp.float32)
    b = scale * jax.random.normal(kb, (1, out_dim), jnp.float32)
    return w, b


def init_bert_params(key, *, num_layers, vocab_size, hidden_size,
                     q_size, k_size, v_size, num_heads, ffn_hidden_size,
                     max_len):
    keys = jax.random.split(key, 3 + num_layers)
    tok_emb = 0.1 * jax.random.normal(keys[0], (vocab_size, hidden_size),
                                      jnp.float32)
    seg_emb = 0.1 * jax.random.normal(keys[1], (2, hidden_size), jnp.float32)
    pos_emb = jax.random.uniform(keys[2], (1, max_len, hidden_size),
                                 jnp.float32)           # torch.rand
    layers = []
    for i in range(num_layers):
        lk = jax.random.split(keys[3 + i], 6)
        wq, bq = init_linear(lk[0], hidden_size, q_size * num_heads)
        wk, bk = init_linear(lk[1], hidden_size, k_size * num_heads)
        wv, bv = init_linear(lk[2], hidden_size, v_size * num_heads)
        wo, bo = init_linear(lk[3], num_heads * v_size, hidden_size)
        g1 = jnp.ones((1, hidden_size), jnp.float32)
        be1 = jnp.zeros((1, hidden_size), jnp.float32)
        w1, b1 = init_linear(lk[4], hidden_size, ffn_hidden_size)
        w2, b2 = init_linear(lk[5], ffn_hidden_size, hidden_size)
        g2 = jnp.ones((1, hidden_size), jnp.float32)
        be2 = jnp.zeros((1, hidden_size), jnp.float32)
        layers.append([wq, bq, wk, bk, wv, bv, wo, bo,
                       g1, be1, w1, b1, w2, b2, g2, be2])
    return tok_emb, seg_emb, pos_emb, layers


def bert_encoder(tokens, segments, valid_lens, params, *, num_heads, head_dim):
    tok_emb, seg_emb, pos_emb, layers = params
    S = tokens.shape[1]
    # Embedding lookups (data-dependent gather) stay in plain JAX glue.
    x = tok_emb[tokens] + seg_emb[segments] + pos_emb[:, :S, :]
    return bert_layers(x, valid_lens, layers,
                       num_heads=num_heads, head_dim=head_dim)


# ----------------------------- pure-JAX reference ---------------------------
def _ref_bert(tokens, segments, valid_lens, params, *, num_heads, head_dim):
    tok_emb, seg_emb, pos_emb, layers = params
    B, S = tokens.shape
    x = tok_emb[tokens] + seg_emb[segments] + pos_emb[:, :S, :]
    key_pos = jnp.arange(S)[None, :]
    mask = key_pos < valid_lens[:, None]                # (B, S)

    def ln(z, g, b):
        mu = jnp.mean(z, -1, keepdims=True)
        var = jnp.mean((z - mu) ** 2, -1, keepdims=True)
        return (z - mu) / jnp.sqrt(var + 1e-5) * g[0] + b[0]

    for (wq, bq, wk, bk, wv, bv, wo, bo, g1, be1,
         w1, b1, w2, b2, g2, be2) in layers:
        q = x @ wq + bq[0]
        k = x @ wk + bk[0]
        v = x @ wv + bv[0]

        def split(t):
            return t.reshape(B, S, num_heads, head_dim).transpose(0, 2, 1, 3)
        qh, kh, vh = split(q), split(k), split(v)
        s = jnp.einsum('bhqd,bhkd->bhqk', qh, kh) / math.sqrt(head_dim)
        s = jnp.where(mask[:, None, None, :], s, -1e9)
        p = jax.nn.softmax(s, axis=-1)
        o = jnp.einsum('bhqk,bhkd->bhqd', p, vh)
        o = o.transpose(0, 2, 1, 3).reshape(B, S, -1)
        y1 = ln(x + o @ wo + bo[0], g1, be1)
        f = jnp.maximum(y1 @ w1 + b1[0], 0.0) @ w2 + b2[0]
        x = ln(y1 + f, g2, be2)
    return x


# --------------------------------- main --------------------------------------
if __name__ == "__main__":
    # small config consistent with the module's forward
    num_layers = 2
    vocab_size = 50
    hidden_size = 32
    q_size = k_size = v_size = 32     # per-head dim == hidden_size (module quirk)
    num_heads = 2
    dropout = 0.0                     # dropout disabled -> deterministic
    ffn_hidden_size = 64
    max_len = 64
    B, S = 2, 8

    # Module quirk: effective head_dim = hidden_size, effective head count
    # = (q_size * num_heads) // hidden_size.
    head_dim = hidden_size
    eff_num_heads = (q_size * num_heads) // hidden_size

    key = jax.random.PRNGKey(0)
    kp, kt, ks = jax.random.split(key, 3)
    params = init_bert_params(
        kp, num_layers=num_layers, vocab_size=vocab_size,
        hidden_size=hidden_size, q_size=q_size, k_size=k_size, v_size=v_size,
        num_heads=num_heads, ffn_hidden_size=ffn_hidden_size, max_len=max_len)

    tokens = jax.random.randint(kt, (B, S), 0, vocab_size, dtype=jnp.int32)
    segments = jax.random.randint(ks, (B, S), 0, 2, dtype=jnp.int32)
    valid_lens = jnp.array([5, 8], dtype=jnp.int32)

    out = bert_encoder(tokens, segments, valid_lens, params,
                       num_heads=eff_num_heads, head_dim=head_dim)
    out = jax.block_until_ready(out)

    ref = _ref_bert(tokens, segments, valid_lens, params,
                    num_heads=eff_num_heads, head_dim=head_dim)
    assert out.shape == (B, S, hidden_size)
    # Tolerance accounts for bf16 MXU operands (f32 accumulation) vs the pure
    # f32 reference; real bugs produce O(0.1 - 1) deviations.
    assert jnp.allclose(out, ref, atol=3e-2, rtol=3e-2), "mismatch vs reference"

    print("KERNEL_OK")
</pallas_src>

<mosaic_0001>
module attributes {stable_mosaic.version = 11 : i64} {
  func.func @bert_layers_kernel(%arg0: i32, %arg1: i32, %arg2: memref<1x1x8xf32, #tpu.memory_space<vmem>>, %arg3: memref<1x8x32xf32, #tpu.memory_space<vmem>>, %arg4: memref<1x32x64xbf16, #tpu.memory_space<vmem>>, %arg5: memref<1x32x64xbf16, #tpu.memory_space<vmem>>, %arg6: memref<1x32x64xbf16, #tpu.memory_space<vmem>>, %arg7: memref<1x64x32xbf16, #tpu.memory_space<vmem>>, %arg8: memref<1x32x64xbf16, #tpu.memory_space<vmem>>, %arg9: memref<1x64x32xbf16, #tpu.memory_space<vmem>>, %arg10: memref<1x10x64xf32, #tpu.memory_space<vmem>>, %arg11: memref<1x8x32xf32, #tpu.memory_space<vmem>>) attributes {dimension_semantics = [#tpu.dimension_semantics<parallel>, #tpu.dimension_semantics<arbitrary>], iteration_bounds = array<i64: 2, 2>, scalar_prefetch = 0 : i64, scratch_operands = 0 : i64, tpu.core_type = #tpu.core_type<tc>, window_params = [{transform_indices = @transform_0, window_bounds = array<i64: 1, 1, 8>}, {transform_indices = @transform_1, window_bounds = array<i64: 1, 8, 32>}, {transform_indices = @transform_2, window_bounds = array<i64: 1, 32, 64>}, {transform_indices = @transform_3, window_bounds = array<i64: 1, 32, 64>}, {transform_indices = @transform_4, window_bounds = array<i64: 1, 32, 64>}, {transform_indices = @transform_5, window_bounds = array<i64: 1, 64, 32>}, {transform_indices = @transform_6, window_bounds = array<i64: 1, 32, 64>}, {transform_indices = @transform_7, window_bounds = array<i64: 1, 64, 32>}, {transform_indices = @transform_8, window_bounds = array<i64: 1, 10, 64>}, {transform_indices = @transform_9, window_bounds = array<i64: 1, 8, 32>}]} {
    %c0_i32 = arith.constant 0 : i32
    %0 = arith.cmpi eq, %arg1, %c0_i32 : i32
    %1 = arith.extui %0 : i1 to i32
    %c0_i32_0 = arith.constant 0 : i32
    %2 = arith.cmpi ne, %1, %c0_i32_0 : i32
    scf.if %2 {
      %c0_68 = arith.constant 0 : index
      %c0_69 = arith.constant 0 : index
      %c0_70 = arith.constant 0 : index
      %147 = vector.load %arg3[%c0_68, %c0_69, %c0_70] : memref<1x8x32xf32, #tpu.memory_space<vmem>>, vector<1x8x32xf32>
      %148 = vector.shape_cast %147 : vector<1x8x32xf32> to vector<8x32xf32>
      %c0_71 = arith.constant 0 : index
      %c0_72 = arith.constant 0 : index
      %c0_73 = arith.constant 0 : index
      %149 = vector.load %arg11[%c0_71, %c0_72, %c0_73] : memref<1x8x32xf32, #tpu.memory_space<vmem>>, vector<1x8x32xf32>
      %150 = vector.shape_cast %149 : vector<1x8x32xf32> to vector<8x32xf32>
      %151 = vector.shape_cast %148 : vector<8x32xf32> to vector<1x8x32xf32>
      tpu.vector_store %arg11[%c0_71, %c0_72, %c0_73], %151 {strides = array<i32>} : memref<1x8x32xf32, #tpu.memory_space<vmem>>, vector<1x8x32xf32>,
    } else {
    }
    %c0 = arith.constant 0 : index
    %c0_1 = arith.constant 0 : index
    %c0_2 = arith.constant 0 : index
    %3 = vector.load %arg11[%c0, %c0_1, %c0_2] : memref<1x8x32xf32, #tpu.memory_space<vmem>>, vector<1x8x32xf32>
    %4 = vector.shape_cast %3 : vector<1x8x32xf32> to vector<8x32xf32>
    %5 = arith.truncf %4 : vector<8x32xf32> to vector<8x32xbf16>
    %c0_3 = arith.constant 0 : index
    %c0_4 = arith.constant 0 : index
    %c0_5 = arith.constant 0 : index
    %6 = vector.load %arg10[%c0_3, %c0_4, %c0_5] : memref<1x10x64xf32, #tpu.memory_space<vmem>>, vector<1x1x64xf32>
    %7 = vector.shape_cast %6 : vector<1x1x64xf32> to vector<1x64xf32>
    %c0_6 = arith.constant 0 : index
    %c1 = arith.constant 1 : index
    %c0_7 = arith.constant 0 : index
    %8 = vector.load %arg10[%c0_6, %c1, %c0_7] : memref<1x10x64xf32, #tpu.memory_space<vmem>>, vector<1x1x64xf32>
    %9 = vector.shape_cast %8 : vector<1x1x64xf32> to vector<1x64xf32>
    %c0_8 = arith.constant 0 : index
    %c2 = arith.constant 2 : index
    %c0_9 = arith.constant 0 : index
    %10 = vector.load %arg10[%c0_8, %c2, %c0_9] : memref<1x10x64xf32, #tpu.memory_space<vmem>>, vector<1x1x64xf32>
    %11 = vector.shape_cast %10 : vector<1x1x64xf32> to vector<1x64xf32>
    %c0_10 = arith.constant 0 : index
    %c3 = arith.constant 3 : index
    %c0_11 = arith.constant 0 : index
    %12 = vector.load %arg10[%c0_10, %c3, %c0_11] : memref<1x10x64xf32, #tpu.memory_space<vmem>>, vector<1x1x32xf32>
    %13 = vector.shape_cast %12 : vector<1x1x32xf32> to vector<1x32xf32>
    %c0_12 = arith.constant 0 : index
    %c4 = arith.constant 4 : index
    %c0_13 = arith.constant 0 : index
    %14 = vector.load %arg10[%c0_12, %c4, %c0_13] : memref<1x10x64xf32, #tpu.memory_space<vmem>>, vector<1x1x32xf32>
    %15 = vector.shape_cast %14 : vector<1x1x32xf32> to vector<1x32xf32>
    %c0_14 = arith.constant 0 : index
    %c5 = arith.constant 5 : index
    %c0_15 = arith.constant 0 : index
    %16 = vector.load %arg10[%c0_14, %c5, %c0_15] : memref<1x10x64xf32, #tpu.memory_space<vmem>>, vector<1x1x32xf32>
    %17 = vector.shape_cast %16 : vector<1x1x32xf32> to vector<1x32xf32>
    %c0_16 = arith.constant 0 : index
    %c6 = arith.constant 6 : index
    %c0_17 = arith.constant 0 : index
    %18 = vector.load %arg10[%c0_16, %c6, %c0_17] : memref<1x10x64xf32, #tpu.memory_space<vmem>>, vector<1x1x64xf32>
    %19 = vector.shape_cast %18 : vector<1x1x64xf32> to vector<1x64xf32>
    %c0_18 = arith.constant 0 : index
    %c7 = arith.constant 7 : index
    %c0_19 = arith.constant 0 : index
    %20 = vector.load %arg10[%c0_18, %c7, %c0_19] : memref<1x10x64xf32, #tpu.memory_space<vmem>>, vector<1x1x32xf32>
    %21 = vector.shape_cast %20 : vector<1x1x32xf32> to vector<1x32xf32>
    %c0_20 = arith.constant 0 : index
    %c8 = arith.constant 8 : index
    %c0_21 = arith.constant 0 : index
    %22 = vector.load %arg10[%c0_20, %c8, %c0_21] : memref<1x10x64xf32, #tpu.memory_space<vmem>>, vector<1x1x32xf32>
    %23 = vector.shape_cast %22 : vector<1x1x32xf32> to vector<1x32xf32>
    %c0_22 = arith.constant 0 : index
    %c9 = arith.constant 9 : index
    %c0_23 = arith.constant 0 : index
    %24 = vector.load %arg10[%c0_22, %c9, %c0_23] : memref<1x10x64xf32, #tpu.memory_space<vmem>>, vector<1x1x32xf32>
    %25 = vector.shape_cast %24 : vector<1x1x32xf32> to vector<1x32xf32>
    %c0_24 = arith.constant 0 : index
    %c0_25 = arith.constant 0 : index
    %c0_26 = arith.constant 0 : index
    %26 = vector.load %arg4[%c0_24, %c0_25, %c0_26] : memref<1x32x64xbf16, #tpu.memory_space<vmem>>, vector<1x32x64xbf16>
    %27 = vector.shape_cast %26 : vector<1x32x64xbf16> to vector<32x64xbf16>
    %cst = arith.constant dense<0.000000e+00> : vector<8x64xf32>
    %28 = tpu.matmul %5, %27, %cst {dimension_numbers = #tpu.dot_dimension_numbers<[1], [0], [0], [1], [0, 0, 1, 1], [], []>} : vector<8x32xbf16>, vector<32x64xbf16>, vector<8x64xf32> -> vector<8x64xf32>
    %29 = vector.broadcast %7 : vector<1x64xf32> to vector<8x64xf32>
    %30 = arith.addf %28, %29 : vector<8x64xf32>
    %31 = arith.truncf %30 : vector<8x64xf32> to vector<8x64xbf16>
    %c0_27 = arith.constant 0 : index
    %c0_28 = arith.constant 0 : index
    %c0_29 = arith.constant 0 : index
    %32 = vector.load %arg5[%c0_27, %c0_28, %c0_29] : memref<1x32x64xbf16, #tpu.memory_space<vmem>>, vector<1x32x64xbf16>
    %33 = vector.shape_cast %32 : vector<1x32x64xbf16> to vector<32x64xbf16>
    %cst_30 = arith.constant dense<0.000000e+00> : vector<8x64xf32>
    %34 = tpu.matmul %5, %33, %cst_30 {dimension_numbers = #tpu.dot_dimension_numbers<[1], [0], [0], [1], [0, 0, 1, 1], [], []>} : vector<8x32xbf16>, vector<32x64xbf16>, vector<8x64xf32> -> vector<8x64xf32>
    %35 = vector.broadcast %9 : vector<1x64xf32> to vector<8x64xf32>
    %36 = arith.addf %34, %35 : vector<8x64xf32>
    %37 = arith.truncf %36 : vector<8x64xf32> to vector<8x64xbf16>
    %c0_31 = arith.constant 0 : index
    %c0_32 = arith.constant 0 : index
    %c0_33 = arith.constant 0 : index
    %38 = vector.load %arg6[%c0_31, %c0_32, %c0_33] : memref<1x32x64xbf16, #tpu.memory_space<vmem>>, vector<1x32x64xbf16>
    %39 = vector.shape_cast %38 : vector<1x32x64xbf16> to vector<32x64xbf16>
    %cst_34 = arith.constant dense<0.000000e+00> : vector<8x64xf32>
    %40 = tpu.matmul %5, %39, %cst_34 {dimension_numbers = #tpu.dot_dimension_numbers<[1], [0], [0], [1], [0, 0, 1, 1], [], []>} : vector<8x32xbf16>, vector<32x64xbf16>, vector<8x64xf32> -> vector<8x64xf32>
    %41 = vector.broadcast %11 : vector<1x64xf32> to vector<8x64xf32>
    %42 = arith.addf %40, %41 : vector<8x64xf32>
    %43 = arith.truncf %42 : vector<8x64xf32> to vector<8x64xbf16>
    %44 = vector.extract_strided_slice %31 {offsets = [0, 0], sizes = [8, 32], strides = [1, 1]} : vector<8x64xbf16> to vector<8x32xbf16>
    %45 = vector.extract_strided_slice %31 {offsets = [0, 32], sizes = [8, 32], strides = [1, 1]} : vector<8x64xbf16> to vector<8x32xbf16>
    %46 = vector.shape_cast %44 : vector<8x32xbf16> to vector<1x8x32xbf16>
    %47 = vector.shape_cast %45 : vector<8x32xbf16> to vector<1x8x32xbf16>
    %48 = tpu.concatenate %46, %47 in 0 : vector<1x8x32xbf16>, vector<1x8x32xbf16> -> vector<2x8x32xbf16>
    %49 = vector.extract_strided_slice %37 {offsets = [0, 0], sizes = [8, 32], strides = [1, 1]} : vector<8x64xbf16> to vector<8x32xbf16>
    %50 = vector.extract_strided_slice %37 {offsets = [0, 32], sizes = [8, 32], strides = [1, 1]} : vector<8x64xbf16> to vector<8x32xbf16>
    %51 = vector.shape_cast %49 : vector<8x32xbf16> to vector<1x8x32xbf16>
    %52 = vector.shape_cast %50 : vector<8x32xbf16> to vector<1x8x32xbf16>
    %53 = tpu.concatenate %51, %52 in 0 : vector<1x8x32xbf16>, vector<1x8x32xbf16> -> vector<2x8x32xbf16>
    %54 = vector.extract_strided_slice %43 {offsets = [0, 0], sizes = [8, 32], strides = [1, 1]} : vector<8x64xbf16> to vector<8x32xbf16>
    %55 = vector.extract_strided_slice %43 {offsets = [0, 32], sizes = [8, 32], strides = [1, 1]} : vector<8x64xbf16> to vector<8x32xbf16>
    %56 = vector.shape_cast %54 : vector<8x32xbf16> to vector<1x8x32xbf16>
    %57 = vector.shape_cast %55 : vector<8x32xbf16> to vector<1x8x32xbf16>
    %58 = tpu.concatenate %56, %57 in 0 : vector<1x8x32xbf16>, vector<1x8x32xbf16> -> vector<2x8x32xbf16>
    "tpu.trace_start"() <{level = 10 : i32, message = "hqd,hkd->hqk"}> : () -> ()
    %cst_35 = arith.constant dense<0.000000e+00> : vector<2x8x8xf32>
    %59 = tpu.matmul %48, %53, %cst_35 {dimension_numbers = #tpu.dot_dimension_numbers<[2], [2], [1], [1], [0, 0, 0, 1, 1, 1], [0], [0]>} : vector<2x8x32xbf16>, vector<2x8x32xbf16>, vector<2x8x8xf32> -> vector<2x8x8xf32>
    "tpu.trace_stop"() : () -> ()
    %c0_36 = arith.constant 0 : index
    %c0_37 = arith.constant 0 : index
    %c0_38 = arith.constant 0 : index
    %60 = vector.load %arg2[%c0_36, %c0_37, %c0_38] : memref<1x1x8xf32, #tpu.memory_space<vmem>>, vector<1x1x8xf32>
    %61 = vector.shape_cast %60 : vector<1x1x8xf32> to vector<1x8xf32>
    %62 = vector.shape_cast %61 : vector<1x8xf32> to vector<1x1x8xf32>
    %63 = vector.broadcast %62 : vector<1x1x8xf32> to vector<2x8x8xf32>
    %64 = arith.addf %59, %63 : vector<2x8x8xf32>
    %cst_39 = arith.constant dense<0xFF800000> : vector<2x8xf32>
    %65 = vector.multi_reduction <maximumf>, %64, %cst_39 [2] : vector<2x8x8xf32> to vector<2x8xf32>
    %66 = vector.shape_cast %65 : vector<2x8xf32> to vector<2x8x1xf32>
    %67 = vector.broadcast %66 : vector<2x8x1xf32> to vector<2x8x8xf32>
    %68 = arith.subf %64, %67 : vector<2x8x8xf32>
    %69 = math.exp %68 : vector<2x8x8xf32>
    %cst_40 = arith.constant dense<0.000000e+00> : vector<2x8xf32>
    %70 = vector.multi_reduction <add>, %69, %cst_40 [2] : vector<2x8x8xf32> to vector<2x8xf32>
    %71 = vector.shape_cast %70 : vector<2x8xf32> to vector<2x8x1xf32>
    %72 = tpu.reciprocal %71 : vector<2x8x1xf32> -> vector<2x8x1xf32>
    %73 = vector.broadcast %72 : vector<2x8x1xf32> to vector<2x8x8xf32>
    %74 = arith.mulf %69, %73 : vector<2x8x8xf32>
    %75 = arith.truncf %74 : vector<2x8x8xf32> to vector<2x8x8xbf16>
    "tpu.trace_start"() <{level = 10 : i32, message = "hqk,hkd->hqd"}> : () -> ()
    %cst_41 = arith.constant dense<0.000000e+00> : vector<2x8x32xf32>
    %76 = tpu.matmul %75, %58, %cst_41 {dimension_numbers = #tpu.dot_dimension_numbers<[2], [1], [1], [2], [0, 0, 0, 1, 1, 2], [0], [0]>} : vector<2x8x8xbf16>, vector<2x8x32xbf16>, vector<2x8x32xf32> -> vector<2x8x32xf32>
    "tpu.trace_stop"() : () -> ()
    %77 = vector.extract_strided_slice %76 {offsets = [0, 0, 0], sizes = [1, 8, 32], strides = [1, 1, 1]} : vector<2x8x32xf32> to vector<1x8x32xf32>
    %78 = vector.shape_cast %77 : vector<1x8x32xf32> to vector<8x32xf32>
    %79 = vector.extract_strided_slice %76 {offsets = [1, 0, 0], sizes = [1, 8, 32], strides = [1, 1, 1]} : vector<2x8x32xf32> to vector<1x8x32xf32>
    %80 = vector.shape_cast %79 : vector<1x8x32xf32> to vector<8x32xf32>
    %81 = tpu.concatenate %78, %80 in 1 : vector<8x32xf32>, vector<8x32xf32> -> vector<8x64xf32>
    %82 = arith.truncf %81 : vector<8x64xf32> to vector<8x64xbf16>
    %c0_42 = arith.constant 0 : index
    %c0_43 = arith.constant 0 : index
    %c0_44 = arith.constant 0 : index
    %83 = vector.load %arg7[%c0_42, %c0_43, %c0_44] : memref<1x64x32xbf16, #tpu.memory_space<vmem>>, vector<1x64x32xbf16>
    %84 = vector.shape_cast %83 : vector<1x64x32xbf16> to vector<64x32xbf16>
    %cst_45 = arith.constant dense<0.000000e+00> : vector<8x32xf32>
    %85 = tpu.matmul %82, %84, %cst_45 {dimension_numbers = #tpu.dot_dimension_numbers<[1], [0], [0], [1], [0, 0, 1, 1], [], []>} : vector<8x64xbf16>, vector<64x32xbf16>, vector<8x32xf32> -> vector<8x32xf32>
    %86 = vector.broadcast %13 : vector<1x32xf32> to vector<8x32xf32>
    %87 = arith.addf %85, %86 : vector<8x32xf32>
    %88 = arith.addf %4, %87 : vector<8x32xf32>
    %cst_46 = arith.constant dense<0.000000e+00> : vector<8xf32>
    %89 = vector.multi_reduction <add>, %88, %cst_46 [1] : vector<8x32xf32> to vector<8xf32>
    %90 = vector.shape_cast %89 : vector<8xf32> to vector<8x1xf32>
    %cst_47 = arith.constant 3.200000e+01 : f32
    %91 = vector.broadcast %cst_47 : f32 to vector<8x1xf32>
    %92 = arith.divf %90, %91 : vector<8x1xf32>
    %93 = vector.broadcast %92 : vector<8x1xf32> to vector<8x32xf32>
    %94 = arith.subf %88, %93 : vector<8x32xf32>
    %95 = arith.mulf %94, %94 : vector<8x32xf32>
    %cst_48 = arith.constant dense<0.000000e+00> : vector<8xf32>
    %96 = vector.multi_reduction <add>, %95, %cst_48 [1] : vector<8x32xf32> to vector<8xf32>
    %97 = vector.shape_cast %96 : vector<8xf32> to vector<8x1xf32>
    %cst_49 = arith.constant 3.200000e+01 : f32
    %98 = vector.broadcast %cst_49 : f32 to vector<8x1xf32>
    %99 = arith.divf %97, %98 : vector<8x1xf32>
    %cst_50 = arith.constant 9.99999974E-6 : f32
    %100 = vector.broadcast %cst_50 : f32 to vector<8x1xf32>
    %101 = arith.addf %99, %100 : vector<8x1xf32>
    %102 = math.rsqrt %101 : vector<8x1xf32>
    %103 = vector.broadcast %102 : vector<8x1xf32> to vector<8x32xf32>
    %104 = arith.mulf %94, %103 : vector<8x32xf32>
    %105 = vector.broadcast %15 : vector<1x32xf32> to vector<8x32xf32>
    %106 = arith.mulf %104, %105 : vector<8x32xf32>
    %107 = vector.broadcast %17 : vector<1x32xf32> to vector<8x32xf32>
    %108 = arith.addf %106, %107 : vector<8x32xf32>
    %109 = arith.truncf %108 : vector<8x32xf32> to vector<8x32xbf16>
    %c0_51 = arith.constant 0 : index
    %c0_52 = arith.constant 0 : index
    %c0_53 = arith.constant 0 : index
    %110 = vector.load %arg8[%c0_51, %c0_52, %c0_53] : memref<1x32x64xbf16, #tpu.memory_space<vmem>>, vector<1x32x64xbf16>
    %111 = vector.shape_cast %110 : vector<1x32x64xbf16> to vector<32x64xbf16>
    %cst_54 = arith.constant dense<0.000000e+00> : vector<8x64xf32>
    %112 = tpu.matmul %109, %111, %cst_54 {dimension_numbers = #tpu.dot_dimension_numbers<[1], [0], [0], [1], [0, 0, 1, 1], [], []>} : vector<8x32xbf16>, vector<32x64xbf16>, vector<8x64xf32> -> vector<8x64xf32>
    %113 = vector.broadcast %19 : vector<1x64xf32> to vector<8x64xf32>
    %114 = arith.addf %112, %113 : vector<8x64xf32>
    %cst_55 = arith.constant 0.000000e+00 : f32
    %115 = vector.broadcast %cst_55 : f32 to vector<8x64xf32>
    %116 = arith.maximumf %114, %115 : vector<8x64xf32>
    %117 = arith.truncf %116 : vector<8x64xf32> to vector<8x64xbf16>
    %c0_56 = arith.constant 0 : index
    %c0_57 = arith.constant 0 : index
    %c0_58 = arith.constant 0 : index
    %118 = vector.load %arg9[%c0_56, %c0_57, %c0_58] : memref<1x64x32xbf16, #tpu.memory_space<vmem>>, vector<1x64x32xbf16>
    %119 = vector.shape_cast %118 : vector<1x64x32xbf16> to vector<64x32xbf16>
    %cst_59 = arith.constant dense<0.000000e+00> : vector<8x32xf32>
    %120 = tpu.matmul %117, %119, %cst_59 {dimension_numbers = #tpu.dot_dimension_numbers<[1], [0], [0], [1], [0, 0, 1, 1], [], []>} : vector<8x64xbf16>, vector<64x32xbf16>, vector<8x32xf32> -> vector<8x32xf32>
    %121 = vector.broadcast %21 : vector<1x32xf32> to vector<8x32xf32>
    %122 = arith.addf %120, %121 : vector<8x32xf32>
    %123 = arith.addf %108, %122 : vector<8x32xf32>
    %cst_60 = arith.constant dense<0.000000e+00> : vector<8xf32>
    %124 = vector.multi_reduction <add>, %123, %cst_60 [1] : vector<8x32xf32> to vector<8xf32>
    %125 = vector.shape_cast %124 : vector<8xf32> to vector<8x1xf32>
    %cst_61 = arith.constant 3.200000e+01 : f32
    %126 = vector.broadcast %cst_61 : f32 to vector<8x1xf32>
    %127 = arith.divf %125, %126 : vector<8x1xf32>
    %128 = vector.broadcast %127 : vector<8x1xf32> to vector<8x32xf32>
    %129 = arith.subf %123, %128 : vector<8x32xf32>
    %130 = arith.mulf %129, %129 : vector<8x32xf32>
    %cst_62 = arith.constant dense<0.000000e+00> : vector<8xf32>
    %131 = vector.multi_reduction <add>, %130, %cst_62 [1] : vector<8x32xf32> to vector<8xf32>
    %132 = vector.shape_cast %131 : vector<8xf32> to vector<8x1xf32>
    %cst_63 = arith.constant 3.200000e+01 : f32
    %133 = vector.broadcast %cst_63 : f32 to vector<8x1xf32>
    %134 = arith.divf %132, %133 : vector<8x1xf32>
    %cst_64 = arith.constant 9.99999974E-6 : f32
    %135 = vector.broadcast %cst_64 : f32 to vector<8x1xf32>
    %136 = arith.addf %134, %135 : vector<8x1xf32>
    %137 = math.rsqrt %136 : vector<8x1xf32>
    %138 = vector.broadcast %137 : vector<8x1xf32> to vector<8x32xf32>
    %139 = arith.mulf %129, %138 : vector<8x32xf32>
    %140 = vector.broadcast %23 : vector<1x32xf32> to vector<8x32xf32>
    %141 = arith.mulf %139, %140 : vector<8x32xf32>
    %142 = vector.broadcast %25 : vector<1x32xf32> to vector<8x32xf32>
    %143 = arith.addf %141, %142 : vector<8x32xf32>
    %c0_65 = arith.constant 0 : index
    %c0_66 = arith.constant 0 : index
    %c0_67 = arith.constant 0 : index
    %144 = vector.load %arg11[%c0_65, %c0_66, %c0_67] : memref<1x8x32xf32, #tpu.memory_space<vmem>>, vector<1x8x32xf32>
    %145 = vector.shape_cast %144 : vector<1x8x32xf32> to vector<8x32xf32>
    %146 = vector.shape_cast %143 : vector<8x32xf32> to vector<1x8x32xf32>
    tpu.vector_store %arg11[%c0_65, %c0_66, %c0_67], %146 {strides = array<i32>} : memref<1x8x32xf32, #tpu.memory_space<vmem>>, vector<1x8x32xf32>,
    return
  }
  func.func @transform_0(%arg0: i32, %arg1: i32) -> (i32, i32, i32) {
    %c0_i32 = arith.constant 0 : i32
    %c0_i32_0 = arith.constant 0 : i32
    %c0_i32_1 = arith.constant 0 : i32
    return %arg0, %c0_i32, %c0_i32_0 : i32, i32, i32
  }
  func.func @transform_1(%arg0: i32, %arg1: i32) -> (i32, i32, i32) {
    %c0_i32 = arith.constant 0 : i32
    %c0_i32_0 = arith.constant 0 : i32
    %c0_i32_1 = arith.constant 0 : i32
    return %arg0, %c0_i32, %c0_i32_0 : i32, i32, i32
  }
  func.func @transform_2(%arg0: i32, %arg1: i32) -> (i32, i32, i32) {
    %c0_i32 = arith.constant 0 : i32
    %c0_i32_0 = arith.constant 0 : i32
    %c0_i32_1 = arith.constant 0 : i32
    return %arg1, %c0_i32, %c0_i32_0 : i32, i32, i32
  }
  func.func @transform_3(%arg0: i32, %arg1: i32) -> (i32, i32, i32) {
    %c0_i32 = arith.constant 0 : i32
    %c0_i32_0 = arith.constant 0 : i32
    %c0_i32_1 = arith.constant 0 : i32
    return %arg1, %c0_i32, %c0_i32_0 : i32, i32, i32
  }
  func.func @transform_4(%arg0: i32, %arg1: i32) -> (i32, i32, i32) {
    %c0_i32 = arith.constant 0 : i32
    %c0_i32_0 = arith.constant 0 : i32
    %c0_i32_1 = arith.constant 0 : i32
    return %arg1, %c0_i32, %c0_i32_0 : i32, i32, i32
  }
  func.func @transform_5(%arg0: i32, %arg1: i32) -> (i32, i32, i32) {
    %c0_i32 = arith.constant 0 : i32
    %c0_i32_0 = arith.constant 0 : i32
    %c0_i32_1 = arith.constant 0 : i32
    return %arg1, %c0_i32, %c0_i32_0 : i32, i32, i32
  }
  func.func @transform_6(%arg0: i32, %arg1: i32) -> (i32, i32, i32) {
    %c0_i32 = arith.constant 0 : i32
    %c0_i32_0 = arith.constant 0 : i32
    %c0_i32_1 = arith.constant 0 : i32
    return %arg1, %c0_i32, %c0_i32_0 : i32, i32, i32
  }
  func.func @transform_7(%arg0: i32, %arg1: i32) -> (i32, i32, i32) {
    %c0_i32 = arith.constant 0 : i32
    %c0_i32_0 = arith.constant 0 : i32
    %c0_i32_1 = arith.constant 0 : i32
    return %arg1, %c0_i32, %c0_i32_0 : i32, i32, i32
  }
  func.func @transform_8(%arg0: i32, %arg1: i32) -> (i32, i32, i32) {
    %c0_i32 = arith.constant 0 : i32
    %c0_i32_0 = arith.constant 0 : i32
    %c0_i32_1 = arith.constant 0 : i32
    return %arg1, %c0_i32, %c0_i32_0 : i32, i32, i32
  }
  func.func @transform_9(%arg0: i32, %arg1: i32) -> (i32, i32, i32) {
    %c0_i32 = arith.constant 0 : i32
    %c0_i32_0 = arith.constant 0 : i32
    %c0_i32_1 = arith.constant 0 : i32
    return %arg0, %c0_i32, %c0_i32_0 : i32, i32, i32
  }
}

</mosaic_0001>

<bundles_post_ra>
// kernel: tpu_custom_call.1
= control target key start
LH: loop header
LB: loop body
LE: loop exit
PB: predicated region body
PF: predicated region fallthrough
CT: control target
= control target key end

     0   :  { %s1826_s0 = inlined_call_operand.vmem [shape: f32[2,1,8], index: 0, kind: input, shape index: {}]   ;;  %s1827_s1 = inlined_call_operand.hbm [shape: f32[2,8,32], index: 1, kind: input, shape index: {}, may-alias: {1,9}]   ;;  %s1828_s2 = inlined_call_operand.vmem [shape: bf16[2,32,64], index: 2, kind: input, shape index: {}]   ;;  %s1829_s3 = inlined_call_operand.vmem [shape: bf16[2,32,64], index: 3, kind: input, shape index: {}]   ;;  %s1830_s4 = inlined_call_operand.vmem [shape: bf16[2,32,64], index: 4, kind: input, shape index: {}]   ;;  %s1831_s5 = inlined_call_operand.vmem [shape: bf16[2,64,32], index: 5, kind: input, shape index: {}]   ;;  %s1832_s6 = inlined_call_operand.vmem [shape: bf16[2,32,64], index: 6, kind: input, shape index: {}]   ;;  %s1833_s7 = inlined_call_operand.vmem [shape: bf16[2,64,32], index: 7, kind: input, shape index: {}]   ;;  %s1834_s8 = inlined_call_operand.vmem [shape: f32[2,10,64], index: 8, kind: input, shape index: {}]   ;;  %s1835_s9 = inlined_call_operand.hbm [shape: f32[2,8,32], index: 9, kind: output, shape index: {}, may-alias: {1,9}]  }
   0x1   :  { %1848 = sst [smem:[#allocation19_spill]] %s1827_s1 }
   0x2   :  { %1849 = sst [smem:[#allocation20_spill]] %s1828_s2 }
   0x3   :  { %1850 = sst [smem:[#allocation21_spill]] %s1835_s9 }
   0x4   :  { %14 = vsyncpa [#allocation3], 0 }
   0x5   :  { %16 = vsyncpa [#allocation3 + $0x1], 0 }
   0x6   :  { %17 = vsyncpa [#allocation4], 0 }
   0x7   :  { %19 = vsyncpa [#allocation4 + $0x1], 0  ;;  %s1581_s30 = smov 0   ;;  %s1583_s10 = smov 0  }
   0x8   :  { %s1585_s11 = smov 0   ;;  %s1587_s12 = smov 0  }
   0x9   :  { %s1589_s13 = smov 0   ;;  %s1591_s14 = smov 0  }
   0xa   :  { %s1593_s15 = smov 0   ;;  %s1595_s16 = smov 0  }
   0xb LB: > { %1851 = sst [smem:[#allocation8_spill]] %s1498_s30  ;;  %s1167_s17 = sadd.s32 4294967295, %s1526_s16   ;;  %s1526_s16 = sphi %s1595_s16, %s25_s16   ;;  %s1522_s15 = sphi %s1593_s15, %s1880_s15   ;;  %s1518_s14 = sphi %s1591_s14, %s1879_s14   ;;  %s1514_s13 = sphi %s1589_s13, %s1878_s13   ;;  %s1510_s12 = sphi %s1587_s12, %s1877_s12   ;;  %s1506_s11 = sphi %s1585_s11, %s1876_s11   ;;  %s1502_s10 = sphi %s1583_s10, %s1875_s10   ;;  %s1498_s30 = sphi %s1581_s30, %s1874_s30  }
   0xc   : > { %1852 = sst [smem:[#allocation9_spill]] %s1502_s10  ;;  %s1168_s18 = sadd.s32 4294967294, %s1526_s16  }
   0xd   : > { %1853 = sst [smem:[#allocation10_spill]] %s1506_s11  ;;  %s34_s19 = sadd.s32 1, %s1518_s14 }
   0xe   : > { %1854 = sst [smem:[#allocation11_spill]] %s1518_s14  ;;  %s37_s20 = sadd.s32 1, %s1522_s15 }
   0xf   : > { %1855 = sst [smem:[#allocation12_spill]] %s1522_s15  ;;  %p35_p0 = scmp.ge.s32.totalorder %s34_s19, 2 }
  0x10   : > { %1856 = sst [smem:[#allocation13_spill]] %s1526_s16  ;;  %s70_s21 = sadd.s32 1, %s1506_s11 }
  0x11   : > { %p77_p1 = scmp.ne.s32.totalorder %s1506_s11, %s1502_s10  ;;  %p78_p2 = scmp.eq.s32.totalorder %s1526_s16, 0 }
  0x12   : > { %s1882_s19 = smov (%p35_p0, %s34_s19), 0  ;;  %s1884_s20 = smov (!%p35_p0, %s37_s20), %s1522_s15 }
  0x13   : > { %1857 = sst [smem:[#allocation14_spill]] %s1882_s19  ;;  %p1632_p3 = por %p78_p2, %p77_p1 }
  0x14   : > { %p83_p4 = scmp.ne.s32.totalorder %s1502_s10, %s1498_s30  ;;  %p39_p5 = scmp.ge.s32.totalorder %s1884_s20, 2 }
  0x15   : > { %p84_p6 = scmp.eq.s32.totalorder %s1167_s17, 0  ;;  %p289_p7 = scmp.eq.s32.totalorder %s1167_s17, 3 }
  0x16   : > { %p295_p8 = scmp.eq.s32.totalorder %s1168_s18, 3  ;;  %s1886_s20 = smov (%p39_p5, %s1884_s20), 0 }
  0x17   : > { %1859 = sst [smem:[#allocation15_spill]] %s1886_s20  ;;  %p1640_p9 = por %p84_p6, %p83_p4 }
  0x18   : > { %p1644_p10 = por %p289_p7, %p77_p1  ;;  %s67_s25 = ssub.s32 %s1522_s15, %s1886_s20 }
  0x19   : > { %p1650_p11 = por %p295_p8, %p83_p4  ;;  %p68_p12 = scmp.eq.s32.totalorder %s67_s25, 0 }
  0x1a   : > { %s1861_s24 = scalar_select %p1644_p10, 1, 0 }
  0x1b   : > { %s1863_s26 = scalar_select %p1650_p11, 1, 0 }
  0x1c   : > { %1862 = sst [smem:[#allocation16_spill]] %s1861_s24  ;;  %p1304_p13 = scmp.lt.s32.totalorder %s1526_s16, 4 }
  0x1d   : > { %1864 = sst [smem:[#allocation17_spill]] %s1863_s26  ;;  %s321_s27 = sand.u32 1, %s1506_s11  }
  0x1e   : > { %s1657_s28 = scalar_select %p68_p12, %s1506_s11, %s70_s21  }
  0x1f   : > { %s1171_s29 = sshll.u32 %s321_s27, 3  ;;  %s1172_s17 = sshll.u32 %s1522_s15, 3 }
  0x20   : > { %1865 = sst [smem:[#allocation18_spill]] %s1657_s28  ;;  %s325_s30 = scalar_lea.vmem [#allocation2], %s1171_s29 }
  0x21   : > { %s1866_s1 = sld [smem:[#allocation19_spill]]  ;;  %s333_s24 = sshll.u32 %s325_s30, 4  ;;  %s334_s24 = int_to_ptr.vmem [resolvable:$true] %s333_s24 }
  0x22   : > { %p1297_p0 = pnand %p1304_p13, %p1632_p3  ;;  %p1173_p1 = scmp.ge.s32.totalorder %s1526_s16, 1 }
  0x23   : > { %p394_p2 = scmp.lt.s32.totalorder %s1526_s16, 5  ;;  %s322_s25 = scalar_lea.sflag [#allocation3], %s321_s27 }
  0x25   : > { %p395_p4 = pnand %p1173_p1, %p394_p2 }
  0x26   : > { %s1668_s21 = sand.u32 (!%p395_p4), 1, %s1502_s10  }
  0x27   : > { %s329_s14 = scalar_lea.hbm %s1866_s1, %s1172_s17  ;;  %398 = sbr.rel (%p395_p4) target bundleno = 1906 (0x772), region = 56 }
  0x28   : > { %s331_s9 = sshll.u32 %s329_s14, 4  ;;  %s1174_s19 = sshll.u32 (!%p395_p4), %s1668_s21, 3  ;;  %s332_s9 = int_to_ptr.hbm [resolvable:$true] %s331_s9 }
  0x29   : > { %1299 = dma.hbm_to_vmem [thread:$0]  (!%p1297_p0), %s332_s9, 128, %s334_s24, %s322_s25  }
  0x2a   : > { %s401_s29 = scalar_lea.sflag (!%p395_p4), [#allocation3], %s1668_s21  ;;  %s404_s30 = scalar_lea.vmem (!%p395_p4), [#allocation2], %s1174_s19 }
  0x2c   : > { %1489 = dma.done.wait (%p1640_p9), %s401_s29, 128  }
  0x2d   : > { %1491 = vsyncadd (%p1640_p9), %s401_s29, 4294967168  ;;  %p478_p3 = scmp.lt.s32.totalorder %s1514_s13, 1  ;;  %p481_p5 = scmp.lt.s32.totalorder %s1510_s12, 1 }
  0x2e   : > { %s1867_s2 = sld [smem:[#allocation20_spill]]  ;;  %s1717_s28 = scalar_lea.vmem [#allocation5], %s1174_s19 }
  0x2f   : > { %s1679_s9 = scalar_select %p478_p3, %s1514_s13, 1 }
  0x30   : > { %s482_s14 = scalar_select %p481_p5, %s1510_s12, 1 }
  0x31   : > { %p1190_p6 = scmp.ne.s32.totalorder %s1510_s12, 0 }
  0x32   : > { %s1269_s17 = sshll.u32 %s482_s14, 4  ;;  %s1272_s18 = sshll.u32 %s482_s14, 5 }
  0x33   : > { %s490_s15 = scalar_lea.vmem %s1829_s3, %s1269_s17  ;;  %s1695_s10 = scalar_lea.vmem %s1830_s4, %s1269_s17 }
  0x34   : > { %s485_s23 = scalar_lea.vmem %s1867_s2, %s1269_s17  ;;  %s1700_s22 = scalar_lea.vmem %s1831_s5, %s1272_s18 }
  0x35   : > { %s1705_s27 = scalar_lea.vmem %s1832_s6, %s1269_s17  ;;  %s1710_s20 = scalar_lea.vmem %s1833_s7, %s1272_s18 }
  0x36   : > { %s1715_s11 = scalar_lea.vmem %s1834_s8, %s1269_s17  ;;  %520 = sbr.rel (%p1190_p6) target bundleno = 61 (0x3d), region = 64 }
  0x3b   : > { %v521_v0 = vld [vmem:[%s404_s30] sm:$0xff]  ;;  %vm522_vm0 = vcmask 261120  }
  0x3c   : > { %523 = vst.msk [vmem:[%s1717_s28] sm:$0xff] %vm522_vm0, %v521_v0 }
  0x3d PF: > { %v1279_v1 = vld [vmem:[%s490_s15 + $0x8] sm:$0xff]  ;;  %v1278_v3 = vld [vmem:[%s490_s15] sm:$0xff]  ;;  %vm553_vm1 = vcmask 261120   ;;  %s1528_s2 = smov 96   ;;  %s1868_s16 = scalar_lea.vmem %s1826_s0, %s1679_s9  ;;  %vm684_vm2 = vcmask 64512   ;;  %vm738_vm3 = vcmask 1043456  }
  0x3e   : > { %v1277_v2 = vld [vmem:[%s485_s23 + $0x8] sm:$0xff]  ;;  %594 = vmatpush.bf16.msra.mxu1 %v1279_v1  ;;  %v1276_v5 = vld [vmem:[%s485_s23] sm:$0xff]  ;;  %vm813_vm12 = vcmask 523264   ;;  %s1266_s26 = sshll.u32 %s1514_s13, 3  ;;  %s1869_s9 = sld [smem:[#allocation21_spill]] }
  0x3f   : > { %563 = vmatpush.bf16.msra.mxu0 %v1277_v2  ;;  %v1373_v7 = vld [vmem:[%s1715_s11 + $0x1] ss:$0 sm:$0xff]  ;;  %v1374_v11 = vld [vmem:[%s1715_s11] ss:$0 sm:$0xff]  ;;  %v1281_v23 = vld [vmem:[%s1695_s10 + $0x8] sm:$0xff]  ;;  %s990_s18 = sshll.u32 %s1717_s28, 4  ;;  %s991_s18 = int_to_ptr.vmem [resolvable:$true] %s990_s18 }
  0x40   : > { %625 = vmatpush.bf16.msra.mxu2 %v1281_v23  ;;  %v1280_v24 = vld [vmem:[%s1695_s10] sm:$0xff]  ;;  %s1529_s10 = smov 32   ;;  %s978_s13 = scalar_lea.sflag [#allocation4], %s1668_s21 }
  0x41   : > { %v1375_v25 = vld [vmem:[%s1868_s16] ss:$0 sm:$0xff]  ;;  %v1376_v32 = vld [vmem:[%s1715_s11 + $0x2] ss:$0 sm:$0xff] }
  0x42   : > { %595 = vmatpush.bf16.msra.mxu1 %v1278_v3 }
  0x43   : > { %v1722_v4 = vld [vmem:[%s1717_s28] sm:$0xff]  ;;  %564 = vmatpush.bf16.msra.mxu0 %v1276_v5 }
  0x44   : > { %v525_v6 = vpack.c.bf16 %v1722_v4, %v1722_v4  ;;  %626 = vmatpush.bf16.msra.mxu2 %v1280_v24  ;;  %v1377_v24 = vld [vmem:[%s1715_s11 + $0x3] ss:$0 sm:$0xff]  ;;  %s1448_s25 = scalar_lea.hbm %s1869_s9, 16 }
  0x46   : > { %1208 = vmatmul.msk.bf16.vlgmr.msra.gmra.mxu1 %vm553_vm1, %v525_v6  ;;  %1199 = vmatmul.msk.bf16.vlgmr.msra.gmra.mxu0 %vm553_vm1, %v525_v6 }
  0x47   : > { %1217 = vmatmul.msk.bf16.vlgmr.msra.gmra.mxu2 %vm553_vm1, %v525_v6 }
  0xc3   : > { %v597_v8 = vpop.f32.mrf.mxu1  ;;  %v566_v9 = vpop.f32.mrf.mxu0 }
  0xc4   : > { %v598_v10 = vadd.f32 %v1373_v7, %v597_v8  ;;  %v567_v13 = vadd.f32 %v1374_v11, %v566_v9 }
  0xc6   : > { %v601_v12 = vpack.c.bf16 %v598_v10, %v598_v10  ;;  %v570_v17 = vpack.c.bf16 %v567_v13, %v567_v13  ;;  %v1285_v13 = vld [vmem:[%s1700_s22 + $0x18] sm:$0xff] }
  0xc8   : > { %637 = vrot.lane.b32.xlu0 %v601_v12, %s1528_s2  ;;  %v650_v14 = vsel %vm553_vm1, %v601_v12, 0 }
  0xc9   : > { %659 = vmatpush.bf16.xpose.msra.mxu3 %v650_v14  ;;  %v1284_v14 = vld [vmem:[%s1700_s22 + $0x10] sm:$0xff] }
  0xca   : > { %v628_v35 = vpop.f32.mrf.mxu2 }
  0xcb   : > { %v599_v15 = vpop.f32.mrf.mxu1  ;;  %v568_v16 = vpop.f32.mrf.mxu0  ;;  %v629_v36 = vadd.f32 %v1376_v32, %v628_v35 }
  0xcc   : > { %v1283_v15 = vld [vmem:[%s1700_s22 + $0x8] sm:$0xff] }
  0xcd   : > { %v632_v38 = vpack.c.bf16 %v629_v36, %v629_v36 }
  0xcf   : > { %v740_v39 = vsel %vm738_vm3, %v632_v38, 0 }
  0xd0   : > { %634 = vrot.lane.b32.xlu0 %v570_v17, %s1528_s2  ;;  %1218 = vmatmul.msk.bf16.vlgmr.msra.gmra.mxu3 %vm553_vm1, %v570_v17 }
  0xd1   : > { %749 = vmatpush.bf16.msrb.mxu1 %v740_v39  ;;  %821 = vmatpush.bf16.msrb.mxu3 %v1285_v13 }
  0xd2   : > { %v630_v42 = vpop.f32.mrf.mxu2 }
  0xd3   : > { %v1286_v42 = vld [vmem:[%s1705_s27] sm:$0xff] }
  0xd5   : > { %822 = vmatpush.bf16.msrb.mxu3 %v1284_v14 }
  0xd9   : > { %823 = vmatpush.bf16.msrb.mxu3 %v1283_v15 }
 0x13a   : > { %v638_v18 = vpop.permute.xlu0 %637 }
 0x13b   : > { %v669_v19 = vsel %vm553_vm1, %v638_v18, 0 }
 0x13c   : > { %678 = vmatpush.bf16.xpose.msrb.mxu0 %v669_v19 }
 0x142   : > { %v635_v20 = vpop.permute.xlu0 %634 }
 0x143   : > { %1219 = vmatmul.msk.bf16.vlgmr.msrb.gmra.mxu0 %vm553_vm1, %v635_v20  ;;  %v1282_v20 = vld [vmem:[%s1700_s22] sm:$0xff] }
 0x144   : > { %824 = vmatpush.bf16.msrb.mxu3 %v1282_v20 }
 0x153   : > { %v661_v21 = vpop.f32.mrf.mxu3 }
 0x154   : > { %v662_v29 = vadd.f32 %v1375_v25, %v661_v21 }
 0x156   : > { %v685_v31 = vsel %vm684_vm2, %v662_v29, -inf }
 0x15b   : > { %v663_v22 = vpop.f32.mrf.mxu3 }
 0x1c0   : > { %v680_v26 = vpop.f32.mrf.mxu0 }
 0x1c1   : > { %v681_v27 = vadd.f32 %v1375_v25, %v680_v26 }
 0x1c3   : > { %v688_v28 = vsel %vm684_vm2, %v681_v27, -inf }
 0x1c4   : > { %689 = vmax.xlane.f32.xlu1 %v688_v28 }
 0x1c8   : > { %v682_v30 = vpop.f32.mrf.mxu0 }
 0x1c9   : > { %v1530_v30 = vmov 32.0  }
 0x1cc   : > { %686 = vmax.xlane.f32.xlu1 %v685_v31 }
 0x237   : > { %v690_v33 = vpop.xlane.xlu1 %689 }
 0x238   : > { %v692_v34 = vsub.f32 %v681_v27, %v690_v33 }
 0x23a   : > { %v695_v37 = vmul.f32 1.442695, %v692_v34 }
 0x23c   : > { %1384 = vpow2.f32 %v695_v37 }
 0x23f   : > { %v687_v40 = vpop.xlane.xlu1 %686 }
 0x240   : > { %v691_v41 = vsub.f32 %v662_v29, %v687_v40 }
 0x242   : > { %v1385_v43 = vpop.eup %1384  ;;  %v693_v44 = vmul.f32 1.442695, %v691_v41  ;;  %v1287_v41 = vld [vmem:[%s1705_s27 + $0x8] sm:$0xff]  ;;  %s988_s27 = scalar_lea.hbm %s1869_s9, %s1266_s26 }
 0x243   : > { %v700_v45 = vsel %vm684_vm2, %v1385_v43, 0.0  ;;  %891 = vmatpush.bf16.msra.mxu0 %v1287_v41  ;;  %s992_s23 = sshll.u32 %s988_s27, 4  ;;  %s993_s23 = int_to_ptr.hbm [resolvable:$true] %s992_s23 }
 0x244   : > { %1386 = vpow2.f32 %v693_v44  ;;  %701 = vadd.xlane.f32.xlu2 %v700_v45  ;;  %s1442_s22 = sshra.s32 %s993_s23, 4  ;;  %s1443_s22 = int_to_ptr.hbm [resolvable:$true] %s1442_s22 }
 0x245   : > { %s1444_s24 = scalar_lea.hbm %s1443_s22, 8  ;;  %p1449_p12 = scmp.lt.s32.totalorder %s1443_s22, %s1869_s9 }
 0x246   : > { %p1445_p7 = scmp.ne.s32.totalorder %s1443_s22, %s1444_s24  ;;  %p1450_p13 = scmp.lt.s32.totalorder %s1448_s25, %s1444_s24 }
 0x247   : > { %892 = vmatpush.bf16.msra.mxu0 %v1286_v42 }
 0x248   : > { %p1446_p8 = pnand %p1445_p7, %p1644_p10  ;;  %p1451_p0 = por %p1450_p13, %p1449_p12 }
 0x24a   : > { %v1387_v46 = vpop.eup %1386  ;;  %p1447_p9 = pneg %p1446_p8 }
 0x24b   : > { %v697_v47 = vsel %vm684_vm2, %v1387_v46, 0.0 }
 0x24c   : > { %698 = vadd.xlane.f32.xlu0 %v697_v47  ;;  %p1452_p1 = pnand %p1451_p0, %p1447_p9 }
 0x25c   : > { %640 = vrot.lane.b32.xlu2 %v632_v38, %s1528_s2 }
 0x2b7   : > { %v702_v48 = vpop.xlane.xlu2 %701 }
 0x2b8   : > { %1388 = vrcp.f32 %v702_v48  ;;  %v728_v55 = vand.u32 2147483648, %v702_v48  ;;  %v726_v57 = vand.u32 2147483647, %v702_v48  ;;  %vm722_vm5 = vweird.f32 %v702_v48 }
 0x2ba   : > { %v729_v60 = vor.u32 1.1754944e-38, %v728_v55  ;;  %vm727_vm7 = vcmp.eq.f32.partialorder %v726_v57, 8.507059e+37 }
 0x2be   : > { %v1389_v49 = vpop.eup %1388 }
 0x2bf   : > { %v718_v50 = vmul.f32 %v1389_v49, %v702_v48  ;;  %v699_v51 = vpop.xlane.xlu0 %698  ;;  %v641_v52 = vpop.permute.xlu2 %640  ;;  %vm723_vm4 = vweird.f32 %v1389_v49 }
 0x2c0   : > { %1390 = vrcp.f32 %v699_v51  ;;  %v759_v54 = vsel %vm738_vm3, %v641_v52, 0  ;;  %vm724_vm6 = vmor %vm722_vm5, %vm723_vm4  ;;  %v714_v2 = vand.u32 2147483648, %v699_v51  ;;  %v712_v5 = vand.u32 2147483647, %v699_v51 }
 0x2c1   : > { %v719_v53 = vsub.f32 1.0, %v718_v50  ;;  %768 = vmatpush.bf16.msrb.mxu2 %v759_v54  ;;  %vm708_vm9 = vweird.f32 %v699_v51  ;;  %1392 = vrcp.f32 %v1530_v30  ;;  %v1378_v54 = vld [vmem:[%s1715_s11 + $0x4] ss:$0 sm:$0xff] }
 0x2c2   : > { %v715_v8 = vor.u32 1.1754944e-38, %v714_v2  ;;  %vm713_vm11 = vcmp.eq.f32.partialorder %v712_v5, 8.507059e+37 }
 0x2c3   : > { %v720_v56 = vmul.f32 %v1389_v49, %v719_v53 }
 0x2c5   : > { %v721_v58 = vadd.f32 %v1389_v49, %v720_v56  ;;  %v1379_v56 = vld [vmem:[%s1715_s11 + $0x5] ss:$0 sm:$0xff] }
 0x2c6   : > { %v1391_v59 = vpop.eup %1390 }
 0x2c7   : > { %v704_v61 = vmul.f32 %v1391_v59, %v699_v51  ;;  %v725_v62 = vsel %vm724_vm6, %v1389_v49, %v721_v58  ;;  %vm709_vm8 = vweird.f32 %v1391_v59  ;;  %v1393_v31 = vpop.eup %1392 }
 0x2c8   : > { %v730_v63 = vsel %vm727_vm7, %v729_v60, %v725_v62  ;;  %vm710_vm10 = vmor %vm708_vm9, %vm709_vm8  ;;  %v835_v32 = vmul.f32 32.0, %v1393_v31  ;;  %vm839_vm13 = vweird.f32 %v1393_v31  ;;  %v1288_v62 = vld [vmem:[%s1710_s20] sm:$0xff] }
 0x2c9   : > { %v705_v0 = vsub.f32 1.0, %v704_v61  ;;  %v732_v1 = vmul.f32 %v1385_v43, %v730_v63  ;;  %v1291_v43 = vld [vmem:[%s1710_s20 + $0x18] sm:$0xff]  ;;  %v1289_v61 = vld [vmem:[%s1710_s20 + $0x8] sm:$0xff]  ;;  %v1380_v63 = vld [vmem:[%s1715_s11 + $0x6] ss:$0 sm:$0xff] }
 0x2ca   : > { %v836_v33 = vsub.f32 1.0, %v835_v32  ;;  %940 = vmatpush.bf16.msra.mxu1 %v1291_v43 }
 0x2cb   : > { %v706_v3 = vmul.f32 %v1391_v59, %v705_v0  ;;  %v734_v6 = vpack.c.bf16 %v732_v1, %v732_v1 }
 0x2cc   : > { %v837_v34 = vmul.f32 %v1393_v31, %v836_v33 }
 0x2cd   : > { %v707_v7 = vadd.f32 %v1391_v59, %v706_v3  ;;  %1221 = vmatmul.msk.bf16.vlgmr.msrb.gmra.mxu2 %vm684_vm2, %v734_v6  ;;  %v1381_v6 = vld [vmem:[%s1715_s11 + $0x7] ss:$0 sm:$0xff] }
 0x2ce   : > { %v838_v35 = vadd.f32 %v1393_v31, %v837_v34 }
 0x2cf   : > { %v711_v9 = vsel %vm710_vm10, %v1391_v59, %v707_v7 }
 0x2d0   : > { %v716_v10 = vsel %vm713_vm11, %v715_v8, %v711_v9  ;;  %v840_v36 = vsel %vm839_vm13, %v1393_v31, %v838_v35 }
 0x2d1   : > { %v731_v11 = vmul.f32 %v1387_v46, %v716_v10  ;;  %v1290_v46 = vld [vmem:[%s1710_s20 + $0x10] sm:$0xff] }
 0x2d2   : > { %941 = vmatpush.bf16.msra.mxu1 %v1290_v46 }
 0x2d3   : > { %v733_v12 = vpack.c.bf16 %v731_v11, %v731_v11 }
 0x2d5   : > { %1220 = vmatmul.msk.bf16.vlgmr.msrb.gmra.mxu1 %vm684_vm2, %v733_v12 }
 0x2d6   : > { %942 = vmatpush.bf16.msra.mxu1 %v1289_v61 }
 0x2da   : > { %943 = vmatpush.bf16.msra.mxu1 %v1288_v62 }
 0x350   : > { %v770_v16 = vpop.f32.mrf.mxu2 }
 0x351   : > { %775 = vrot.lane.b32.xlu1 %v770_v16, %s1529_s10 }
 0x352   : > { %v751_v17 = vpop.f32.mrf.mxu1 }
 0x358   : > { %v772_v18 = vpop.f32.mrf.mxu2 }
 0x35a   : > { %v753_v19 = vpop.f32.mrf.mxu1 }
 0x3c3   : > { %v776_v21 = vpop.permute.xlu1 %775 }
 0x3c4   : > { %v778_v22 = vsel %vm553_vm1, %v751_v17, %v776_v21 }
 0x3c5   : > { %v779_v23 = vpack.c.bf16 %v778_v22, %v778_v22 }
 0x3c7   : > { %1238 = vmatmul.msk.bf16.vlgmr.msrb.gmra.mxu3 %vm813_vm12, %v779_v23 }
 0x44a   : > { %v826_v25 = vpop.f32.mrf.mxu3 }
 0x44b   : > { %v827_v26 = vadd.f32 %v1377_v24, %v826_v25 }
 0x44d   : > { %v830_v27 = vadd.f32 %v827_v26, %v1722_v4  ;;  %v1382_v26 = vld [vmem:[%s1715_s11 + $0x8] ss:$0 sm:$0xff] }
 0x44f   : > { %v831_v28 = vsel %vm553_vm1, %v830_v27, 0.0 }
 0x450   : > { %832 = vadd.xlane.f32.xlu2 %v831_v28 }
 0x452   : > { %v828_v29 = vpop.f32.mrf.mxu3 }
 0x453   : > { %v1383_v29 = vld [vmem:[%s1715_s11 + $0x9] ss:$0 sm:$0xff] }
 0x4c3   : > { %v833_v37 = vpop.xlane.xlu2 %832 }
 0x4c4   : > { %v841_v38 = vmul.f32 %v840_v36, %v833_v37 }
 0x4c6   : > { %v842_v4 = vsub.f32 %v830_v27, %v841_v38 }
 0x4c8   : > { %v843_v39 = vmul.f32 %v842_v4, %v842_v4 }
 0x4ca   : > { %v844_v40 = vsel %vm553_vm1, %v843_v39, 0.0 }
 0x4cb   : > { %845 = vadd.xlane.f32.xlu1 %v844_v40 }
 0x53e   : > { %v846_v44 = vpop.xlane.xlu1 %845 }
 0x53f   : > { %v847_v45 = vmul.f32 %v846_v44, %v840_v36 }
 0x541   : > { %v848_v47 = vadd.f32 1e-05, %v847_v45 }
 0x543   : > { %1394 = vrsqrt.f32 %v848_v47  ;;  %vm855_vm15 = vweird.f32 %v848_v47 }
 0x549   : > { %v1395_v48 = vpop.eup %1394 }
 0x54a   : > { %v850_v49 = vmul.f32 %v1395_v48, %v848_v47  ;;  %vm856_vm14 = vweird.f32 %v1395_v48 }
 0x54b   : > { %vm857_vm0 = vmor %vm855_vm15, %vm856_vm14 }
 0x54c   : > { %v851_v50 = vmul.f32 %v1395_v48, %v850_v49 }
 0x54e   : > { %v852_v51 = vmul.f32 0.5, %v851_v50 }
 0x550   : > { %v853_v52 = vsub.f32 1.5, %v852_v51 }
 0x552   : > { %v854_v53 = vmul.f32 %v1395_v48, %v853_v52 }
 0x554   : > { %v858_v55 = vsel %vm857_vm0, %v1395_v48, %v854_v53 }
 0x555   : > { %v859_v57 = vmul.f32 %v858_v55, %v842_v4 }
 0x557   : > { %v861_v58 = vmul.f32 %v1378_v54, %v859_v57 }
 0x559   : > { %v863_v59 = vadd.f32 %v1379_v56, %v861_v58 }
 0x55b   : > { %v864_v60 = vpack.c.bf16 %v863_v59, %v863_v59 }
 0x55d   : > { %1247 = vmatmul.msk.bf16.vlgmr.msra.gmra.mxu0 %vm553_vm1, %v864_v60 }
 0x5da   : > { %v894_v0 = vpop.f32.mrf.mxu0 }
 0x5db   : > { %v895_v1 = vadd.f32 %v1380_v63, %v894_v0 }
 0x5dd   : > { %v898_v2 = vmax.f32 %v895_v1, 0.0 }
 0x5df   : > { %v899_v3 = vpack.c.bf16 %v898_v2, %v898_v2 }
 0x5e1   : > { %1264 = vmatmul.msk.bf16.vlgmr.msra.gmra.mxu1 %vm813_vm12, %v899_v3 }
 0x5e2   : > { %v896_v5 = vpop.f32.mrf.mxu0 }
 0x65e   : > { %v945_v7 = vpop.f32.mrf.mxu1 }
 0x65f   : > { %v946_v8 = vadd.f32 %v1381_v6, %v945_v7 }
 0x661   : > { %v949_v9 = vadd.f32 %v946_v8, %v863_v59 }
 0x663   : > { %v950_v10 = vsel %vm553_vm1, %v949_v9, 0.0 }
 0x664   : > { %951 = vadd.xlane.f32.xlu0 %v950_v10 }
 0x666   : > { %v947_v11 = vpop.f32.mrf.mxu1 }
 0x6d7   : > { %v952_v12 = vpop.xlane.xlu0 %951 }
 0x6d8   : > { %v953_v13 = vmul.f32 %v952_v12, %v840_v36 }
 0x6da   : > { %v954_v14 = vsub.f32 %v949_v9, %v953_v13 }
 0x6dc   : > { %v955_v15 = vmul.f32 %v954_v14, %v954_v14 }
 0x6de   : > { %v956_v16 = vsel %vm553_vm1, %v955_v15, 0.0 }
 0x6df   : > { %957 = vadd.xlane.f32.xlu0 %v956_v16 }
 0x752   : > { %v958_v17 = vpop.xlane.xlu0 %957 }
 0x753   : > { %v959_v18 = vmul.f32 %v958_v17, %v840_v36 }
 0x755   : > { %v960_v19 = vadd.f32 1e-05, %v959_v18 }
 0x757   : > { %1396 = vrsqrt.f32 %v960_v19  ;;  %vm967_vm3 = vweird.f32 %v960_v19 }
 0x75d   : > { %v1397_v20 = vpop.eup %1396 }
 0x75e   : > { %v962_v21 = vmul.f32 %v1397_v20, %v960_v19  ;;  %vm968_vm2 = vweird.f32 %v1397_v20 }
 0x75f   : > { %vm969_vm4 = vmor %vm967_vm3, %vm968_vm2 }
 0x760   : > { %v963_v22 = vmul.f32 %v1397_v20, %v962_v21 }
 0x762   : > { %v964_v23 = vmul.f32 0.5, %v963_v22 }
 0x764   : > { %v965_v24 = vsub.f32 1.5, %v964_v23 }
 0x766   : > { %v966_v25 = vmul.f32 %v1397_v20, %v965_v24 }
 0x768   : > { %v970_v27 = vsel %vm969_vm4, %v1397_v20, %v966_v25 }
 0x769   : > { %v971_v28 = vmul.f32 %v970_v27, %v954_v14 }
 0x76b   : > { %v973_v30 = vmul.f32 %v1382_v26, %v971_v28 }
 0x76d   : > { %v975_v31 = vadd.f32 %v1383_v29, %v973_v30 }
 0x76f   : > { %976 = vst.msk [vmem:[%s1717_s28] sm:$0xff] %vm553_vm1, %v975_v31 }
 0x770   : > { %1455 = shalt.err (!%p1452_p1)
}
 0x771   : > { %1294 = dma.vmem_to_hbm [thread:$0]  (%p1644_p10), %s991_s18, 128, %s993_s23, %s978_s13  }
 0x772 PF: > { %s1871_s21 = sld [smem:[#allocation13_spill]] }
 0x773   : > { %s1872_s11 = sld [smem:[#allocation8_spill]] }
 0x778   : > { %p1305_p2 = scmp.ge.s32.totalorder %s1871_s21, 2 }
 0x779   : > { %s1004_s2 = sand.u32 1, %s1872_s11  }
 0x77a   : > { %p1301_p4 = pnand %p1305_p2, %p1650_p11  ;;  %s1005_s12 = scalar_lea.sflag [#allocation4], %s1004_s2 }
 0x77c   : > { %p1302_p3 = pneg %p1301_p4 }
 0x77e   : > { %1493 = dma.done.wait (%p1302_p3), %s1005_s12, 128  }
 0x77f   : > { %1495 = vsyncadd (%p1302_p3), %s1005_s12, 4294967168  ;;  %s25_s16 = sadd.s32 1, %s1871_s21   ;;  %s1874_s30 = sld [smem:[#allocation9_spill]] }
 0x780   : > { %p22_p5 = scmp.ge.s32.totalorder %s25_s16, 6   ;;  %s1875_s10 = sld [smem:[#allocation10_spill]] }
 0x781   : > { %s1876_s11 = sld [smem:[#allocation18_spill]] }
 0x782   : > { %s1877_s12 = sld [smem:[#allocation11_spill]]  ;;  %24 = sbr.rel (!%p22_p5) target bundleno = 11 (0xb), region = 129 }
 0x783   : > { %s1878_s13 = sld [smem:[#allocation12_spill]] }
 0x784   : > { %s1879_s14 = sld [smem:[#allocation14_spill]] }
 0x785   : > { %s1880_s15 = sld [smem:[#allocation15_spill]] }
 0x787   :  { %1011 = vsyncpa [#allocation3], 1 }
 0x788   :  { %1013 = vsyncpa [#allocation3 + $0x1], 1 }
 0x789   :  { %1014 = vsyncpa [#allocation4], 1 }
 0x78a   :  { %1016 = vsyncpa [#allocation4 + $0x1], 1 }

</bundles_post_ra>
